<compile_context>
chip_gen: v5e
topology: v5e:2x2
jax: 0.10.0
libtpu: 0.0.40
codegen_flags: <defaults>
</compile_context>

<pallas_src>
import jax
import jax.numpy as jnp
from jax.experimental import pallas as pl
from jax.experimental.pallas import tpu as pltpu

LANES = 128


def _square_kernel(x_ref, o_ref):
    # hot path: one vld + one vmul + one vst per vreg, purely HBM-bound
    x = x_ref[...]
    o_ref[...] = x * x


def _round_up(x, m):
    return ((x + m - 1) // m) * m


def _square_rows(x2d, *, sub_min):
    """Square a lane-dense [rows, 128] slab with one pallas_call."""
    rows, _ = x2d.shape
    itemsize = jnp.dtype(x2d.dtype).itemsize
    row_bytes = LANES * itemsize

    # ~8 MiB blocks amortize the ~0.35 us per-grid-step overhead on all gens.
    target_rows = max(sub_min, ((8 * 1024 * 1024) // row_bytes // sub_min) * sub_min)
    # Only split across grid steps when each piece stays >= ~512 KiB.
    min_split_rows = max(sub_min, ((512 * 1024) // row_bytes // sub_min) * sub_min)

    if rows < 2 * min_split_rows:
        # single full-array block (block dim == array dim, exempt from the
        # sublane-multiple rule); splitting tiny work across TCs only adds overhead
        tr, grid = rows, 1
    else:
        grid = max(2, pl.cdiv(rows, target_rows))
        # v7x has 2 TensorCores sharing the "parallel" grid axis: prefer an
        # even number of steps for small grids so both cores get equal work.
        if 2 <= grid <= 8 and grid % 2 == 1:
            grid += 1
        # rebalance so blocks are near-equal (avoid one full block + one tiny
        # masked block idling a core); keep tr a multiple of the sublane minimum
        tr = max(sub_min, _round_up(pl.cdiv(rows, grid), sub_min))
        grid = pl.cdiv(rows, tr)

    tile_bytes = tr * row_bytes
    # in+out double-buffered = 4 * tile_bytes; keep headroom under v7x's 64 MiB
    vmem_limit = int(max(32 * 1024 * 1024, min(6 * tile_bytes, 56 * 1024 * 1024)))

    return pl.pallas_call(
        _square_kernel,
        out_shape=jax.ShapeDtypeStruct((rows, LANES), x2d.dtype),
        grid_spec=pltpu.PrefetchScalarGridSpec(
            num_scalar_prefetch=0,
            grid=(grid,),
            in_specs=[pl.BlockSpec((tr, LANES), lambda i: (i, 0))],
            out_specs=pl.BlockSpec((tr, LANES), lambda i: (i, 0)),
        ),
        compiler_params=pltpu.CompilerParams(
            dimension_semantics=("parallel",),
            vmem_limit_bytes=vmem_limit,
        ),
        cost_estimate=pl.CostEstimate(
            flops=rows * LANES,
            transcendentals=0,
            bytes_accessed=2 * rows * LANES * itemsize,
        ),
    )(x2d)


def square(t: jax.Array) -> jax.Array:
    """Elementwise square of `t` (any shape/dtype), via a Pallas TPU kernel."""
    orig_shape = t.shape
    dtype = t.dtype
    itemsize = jnp.dtype(dtype).itemsize
    # dtype-aware sublane minimum: 8 for f32, 16 for bf16, 32 for int8/fp8
    sub_min = max(8, 32 // max(itemsize, 1))

    flat = t.reshape(-1)
    n = flat.shape[0]
    if n == 0:
        return t

    # Tiny inputs: a fused XLA elementwise op beats a custom-call launch.
    if n < sub_min * LANES:
        return (flat * flat).reshape(orig_shape)

    # Cut at a multiple of LANES; Pallas masks the partial last sublane block.
    n_main = (n // LANES) * LANES
    rows = n_main // LANES

    if n_main == n:
        # Common case: zero-copy reshape, single pallas_call, no tail.
        out2d = _square_rows(flat.reshape(rows, LANES), sub_min=sub_min)
        return out2d.reshape(orig_shape)

    # Rare path (n % 128 != 0): kernel on the 128-aligned prefix, plain jnp on
    # the <128-element tail. Costs one output-sized copy for the combine.
    out_main = _square_rows(flat[:n_main].reshape(rows, LANES), sub_min=sub_min)
    tail = flat[n_main:]
    out_flat = jnp.concatenate([out_main.reshape(-1), tail * tail])
    return out_flat.reshape(orig_shape)


if __name__ == "__main__":
    key = jax.random.PRNGKey(0)
    # NCHW input consistent with a conv-style pipeline: batch=2, channels=4, 16x16 spatial
    x = jax.random.normal(key, (2, 4, 16, 16), dtype=jnp.float32)

    y = square(x)
    y = jax.block_until_ready(y)

    # correctness check against plain JAX reference (exact for floats)
    ref = x * x
    assert y.shape == x.shape and y.dtype == x.dtype
    assert jnp.allclose(y, ref, atol=0.0, rtol=0.0)

    print("KERNEL_OK")
</pallas_src>

<mosaic_0001>
module attributes {stable_mosaic.version = 11 : i64} {
  func.func @_square_kernel(%arg0: i32, %arg1: memref<16x128xf32, #tpu.memory_space<vmem>>, %arg2: memref<16x128xf32, #tpu.memory_space<vmem>>) attributes {dimension_semantics = [#tpu.dimension_semantics<parallel>], iteration_bounds = array<i64: 1>, scalar_prefetch = 0 : i64, scratch_operands = 0 : i64, tpu.core_type = #tpu.core_type<tc>, window_params = [{transform_indices = @transform_0, window_bounds = array<i64: 16, 128>}, {transform_indices = @transform_1, window_bounds = array<i64: 16, 128>}]} {
    %c0 = arith.constant 0 : index
    %c0_0 = arith.constant 0 : index
    %0 = vector.load %arg1[%c0, %c0_0] : memref<16x128xf32, #tpu.memory_space<vmem>>, vector<16x128xf32>
    %1 = arith.mulf %0, %0 : vector<16x128xf32>
    %c0_1 = arith.constant 0 : index
    %c0_2 = arith.constant 0 : index
    %2 = vector.load %arg2[%c0_1, %c0_2] : memref<16x128xf32, #tpu.memory_space<vmem>>, vector<16x128xf32>
    tpu.vector_store %arg2[%c0_1, %c0_2], %1 {strides = array<i32>} : memref<16x128xf32, #tpu.memory_space<vmem>>, vector<16x128xf32>,
    return
  }
  func.func @transform_0(%arg0: i32) -> (i32, i32) {
    %c0_i32 = arith.constant 0 : i32
    %c0_i32_0 = arith.constant 0 : i32
    return %arg0, %c0_i32 : i32, i32
  }
  func.func @transform_1(%arg0: i32) -> (i32, i32) {
    %c0_i32 = arith.constant 0 : i32
    %c0_i32_0 = arith.constant 0 : i32
    return %arg0, %c0_i32 : i32, i32
  }
}

</mosaic_0001>

<bundles_post_ra>
// kernel: tpu_custom_call.1
= control target key start
LH: loop header
LB: loop body
LE: loop exit
PB: predicated region body
PF: predicated region fallthrough
CT: control target
= control target key end

     0   :  { %6 = vsyncpa [#allocation3], 0  ;;  %s126_s0 = inlined_call_operand.hbm [shape: f32[16,128], index: 0, kind: input, shape index: {}]   ;;  %s127_s1 = inlined_call_operand.hbm [shape: f32[16,128], index: 1, kind: output, shape index: {}]  }
   0x1   :  { %7 = vsyncpa [#allocation4], 0  ;;  %s12_s8 = sshll.u32 %s126_s0, 4  ;;  %s106_s9 = smov [#allocation2]   ;;  %s13_s8 = int_to_ptr.hbm [resolvable:$true] %s12_s8 }
   0x2   :  { %s14_s10 = sshll.u32 %s106_s9, 4  ;;  %s107_s11 = smov 128   ;;  %s15_s10 = int_to_ptr.vmem [resolvable:$true] %s14_s10 }
   0x3   :  { %s108_s12 = smov 8  }
   0x4   :  { %20 = dma.hbm_to_vmem [thread:$0]  %s13_s8, 256, %s15_s10, [#allocation3], %s107_s11, %s107_s11, %s108_s12  }
   0x5   :  { %102 = dma.done.wait [#allocation3], 256  }
   0x6   :  { %103 = vsyncadd [#allocation3], 4294967040  ;;  %s109_s13 = smov [#allocation5]   ;;  %s37_s17 = sshll.u32 %s127_s1, 4  ;;  %v25_v0 = vld [vmem:[#allocation2] sm:$0xff]  ;;  %v26_v1 = vld [vmem:[#allocation2 + $0x8] sm:$0xff]  ;;  %s38_s17 = int_to_ptr.hbm [resolvable:$true] %s37_s17 }
   0x7   :  { %s35_s14 = sshll.u32 %s109_s13, 4  ;;  %v27_v2 = vmul.f32 %v25_v0, %v25_v0  ;;  %v28_v3 = vmul.f32 %v26_v1, %v26_v1  ;;  %s36_s14 = int_to_ptr.vmem [resolvable:$true] %s35_s14 }
   0x9   :  { %29 = vst [vmem:[#allocation5] sm:$0xff] %v27_v2 }
   0xa   :  { %30 = vst [vmem:[#allocation5 + $0x8] sm:$0xff] %v28_v3 }
   0xb   :  { %43 = dma.vmem_to_hbm [thread:$0]  %s36_s14, 256, %s38_s17, [#allocation4], %s107_s11, %s107_s11, %s108_s12  }
   0xc   :  { %104 = dma.done.wait [#allocation4], 256  }
   0xd   :  { %105 = vsyncadd [#allocation4], 4294967040 }
   0xe   :  { %48 = vsyncpa [#allocation3], 1 }
   0xf   :  { %49 = vsyncpa [#allocation4], 1 }

</bundles_post_ra>
